<compile_context>
chip_gen: v7x
topology: tpu7x:2x2x1
jax: 0.10.0
libtpu: 0.0.40
codegen_flags: <defaults>
</compile_context>

<pallas_src>
import functools

import jax
import jax.numpy as jnp
from jax import lax
from jax.experimental import pallas as pl
from jax.experimental.pallas import tpu as pltpu


# --------------------------------------------------------------------------
# Kernel 1: hoisted input projection + LSTM recurrence (gridless, serial)
# --------------------------------------------------------------------------
def _lstm_kernel(x_ref, w_ih_ref, w_hh_ref, b_ref, h0_ref, c0_ref,
                 hs_ref, hn_ref, cn_ref, xw_sc):
    L = hs_ref.shape[0]
    H = hn_ref.shape[1]

    # Hoisted input projection: one (L,E)x(E,4H) bf16 MXU matmul + bias,
    # outside the serial recurrence.
    xw_sc[...] = (
        jnp.dot(x_ref[...].astype(jnp.bfloat16), w_ih_ref[...],
                preferred_element_type=jnp.float32)
        + b_ref[...]
    )

    # LSTM recurrence. Gates are laid out [i, f, o | g] (host permutes the
    # weights), so each step pushes ONE sigmoid over 3H lanes and ONE tanh
    # over H lanes to the EUP instead of 3 sigmoids + 2 tanh.
    # TODO(synk): for real configs pad H to a multiple of 128 so each gate
    #             slice is a whole-vreg view (no cross-lane work per step).
    def step(t, carry):
        h, c = carry                                            # (1, H) f32
        gates = xw_sc[pl.ds(t, 1), :] + jnp.dot(
            h, w_hh_ref[...], preferred_element_type=jnp.float32)   # (1, 4H)
        sig = jax.nn.sigmoid(gates[:, :3 * H])
        g_g = jnp.tanh(gates[:, 3 * H:])
        i_g = sig[:, 0 * H:1 * H]
        f_g = sig[:, 1 * H:2 * H]
        o_g = sig[:, 2 * H:3 * H]
        c_new = f_g * c + i_g * g_g
        h_new = o_g * jnp.tanh(c_new)
        hs_ref[pl.ds(t, 1), :] = h_new
        return (h_new, c_new)

    h_fin, c_fin = lax.fori_loop(0, L, step, (h0_ref[...], c0_ref[...]),
                                 unroll=min(8, L))
    hn_ref[...] = h_fin
    cn_ref[...] = c_fin


# --------------------------------------------------------------------------
# Kernel 2: fused vocab-tiled projection + ReLU + online LSE + log-softmax
# --------------------------------------------------------------------------
def _proj_logsoftmax_kernel(hs_ref, w_out_ref, b_out_ref, out_ref,
                            m_sc, l_sc, lse_sc, *, vocab_size, tile):
    p = pl.program_id(0)     # 0: online log-sum-exp pass, 1: normalize+write
    j = pl.program_id(1)     # vocab tile
    nv = pl.num_programs(1)

    @pl.when((p == 0) & (j == 0))
    def _():
        m_sc[...] = jnp.full(m_sc.shape, -jnp.inf, m_sc.dtype)
        l_sc[...] = jnp.zeros(l_sc.shape, l_sc.dtype)

    logits = jnp.dot(hs_ref[...].astype(jnp.bfloat16), w_out_ref[...],
                     preferred_element_type=jnp.float32) + b_out_ref[...]
    a = jnp.maximum(logits, 0.0)                      # ReLU (as in the module)

    # Mask padded vocab lanes out of the log-sum-exp (ReLU would otherwise
    # turn padded logits into 0 and corrupt the normalizer).
    col = j * tile + lax.broadcasted_iota(jnp.int32, a.shape, 1)
    a_m = jnp.where(col < vocab_size, a, -jnp.inf)

    @pl.when(p == 0)
    def _():
        tile_max = jnp.max(a_m, axis=1, keepdims=True)
        m_new = jnp.maximum(m_sc[...], tile_max)
        l_sc[...] = (l_sc[...] * jnp.exp(m_sc[...] - m_new)
                     + jnp.sum(jnp.exp(a_m - m_new), axis=1, keepdims=True))
        m_sc[...] = m_new

    @pl.when((p == 0) & (j == nv - 1))
    def _():
        lse_sc[...] = m_sc[...] + jnp.log(l_sc[...])

    @pl.when(p == 1)
    def _():
        out_ref[...] = a - lse_sc[...]


# --------------------------------------------------------------------------
# Helpers
# --------------------------------------------------------------------------
def _to_ifog(w, axis):
    """Permute LSTM gate blocks from PyTorch [i,f,g,o] to [i,f,o,g]."""
    i, f, g, o = jnp.split(w, 4, axis=axis)
    return jnp.concatenate([i, f, o, g], axis=axis)


def _pick_vocab_tile(v, h, l, budget_bytes=12 << 20):
    """Largest 128-multiple tile (<=4096) whose double-buffered stream fits."""
    cap = max(128, pl.next_power_of_2(v))
    for t in (4096, 2048, 1024, 512, 256, 128):
        if t > cap:
            continue
        need = 2 * (h * t * 2 + t * 4 + l * t * 4)   # w_out + b_out + out, x2 buffers
        if need <= budget_bytes:
            return t
    return 128


# --------------------------------------------------------------------------
# Wrapper
# --------------------------------------------------------------------------
def poetry_model_forward(tokens, hidden, params):
    """tokens: (L,) int; hidden: (h0, c0) each (1, 1, H)."""
    emb, w_ih, w_hh, b, w_out, b_out = params
    L = tokens.shape[0]
    V, E = emb.shape
    H = w_hh.shape[0]
    h0, c0 = hidden

    # ---- host-side prep (plain XLA, static shapes) ----
    # Embedding gather in the wrapper: the kernel never holds the (V,E) table.
    # NOTE: OOB token ids are clamped here; PyTorch's nn.Embedding would raise.
    x = jnp.take(emb.astype(jnp.float32), tokens.astype(jnp.int32), axis=0,
                 mode="clip")                                        # (L, E)

    w_ih_k = _to_ifog(w_ih.astype(jnp.float32), axis=1).astype(jnp.bfloat16)
    w_hh_k = _to_ifog(w_hh.astype(jnp.float32), axis=1)   # f32: recurrence precision
    b_k = _to_ifog(b.astype(jnp.float32).reshape(1, 4 * H), axis=1)
    h0_2d = h0.reshape(1, H).astype(jnp.float32)
    c0_2d = c0.reshape(1, H).astype(jnp.float32)

    vmem = pl.BlockSpec(memory_space=pltpu.MemorySpace.VMEM)

    # ---- Kernel 1: serial LSTM part ----
    k1_bytes = (L * E * 4 + E * 4 * H * 2 + H * 4 * H * 4 + 4 * H * 4
                + 2 * H * 4 + L * H * 4 + 2 * H * 4 + L * 4 * H * 4)
    hs, h_n, c_n = pl.pallas_call(
        _lstm_kernel,
        out_shape=(
            jax.ShapeDtypeStruct((L, H), jnp.float32),   # per-step hidden states
            jax.ShapeDtypeStruct((1, H), jnp.float32),   # h_n
            jax.ShapeDtypeStruct((1, H), jnp.float32),   # c_n
        ),
        in_specs=[vmem] * 6,
        out_specs=(vmem, vmem, vmem),
        scratch_shapes=[pltpu.VMEM((L, 4 * H), jnp.float32)],   # hoisted xw
        compiler_params=pltpu.CompilerParams(
            vmem_limit_bytes=int(2 * k1_bytes + (4 << 20))),
    )(x, w_ih_k, w_hh_k, b_k, h0_2d, c0_2d)

    # ---- Kernel 2: fused output projection + ReLU + log-softmax ----
    tV = _pick_vocab_tile(V, H, L)
    v_pad = ((V + tV - 1) // tV) * tV
    nV = v_pad // tV

    w_out_k = w_out.astype(jnp.bfloat16)
    b_out_k = b_out.astype(jnp.float32).reshape(1, V)
    if v_pad != V:
        w_out_k = jnp.pad(w_out_k, ((0, 0), (0, v_pad - V)))
        b_out_k = jnp.pad(b_out_k, ((0, 0), (0, v_pad - V)))

    # TODO(synk): on v7x, split the vocab stream across both TensorCores
    #             (leading core axis + per-core (m,l) partials + combine).
    k2_bytes = (2 * (H * tV * 2 + tV * 4 + L * tV * 4)
                + 2 * L * H * 4 + 3 * L * 4)
    out_pad = pl.pallas_call(
        functools.partial(_proj_logsoftmax_kernel, vocab_size=V, tile=tV),
        out_shape=jax.ShapeDtypeStruct((L, v_pad), jnp.float32),
        grid=(2, nV),
        in_specs=[
            pl.BlockSpec((L, H), lambda p, j: (0, 0)),    # hs stays resident
            pl.BlockSpec((H, tV), lambda p, j: (0, j)),   # stream w_out tiles
            pl.BlockSpec((1, tV), lambda p, j: (0, j)),
        ],
        # pass 0 parks the (untouched) output buffer on block 0; pass 1 writes
        # every tile exactly once -> single lane-dense HBM write, no act round trip
        out_specs=pl.BlockSpec((L, tV), lambda p, j: (0, j * p)),
        scratch_shapes=[
            pltpu.VMEM((L, 1), jnp.float32),              # running max
            pltpu.VMEM((L, 1), jnp.float32),              # running sum-exp
            pltpu.VMEM((L, 1), jnp.float32),              # log-sum-exp
        ],
        compiler_params=pltpu.CompilerParams(
            dimension_semantics=("arbitrary", "arbitrary"),
            vmem_limit_bytes=int(2 * k2_bytes + (4 << 20))),
    )(hs, w_out_k, b_out_k)

    out = out_pad[:, :V] if v_pad != V else out_pad
    return out, (h_n.reshape(1, 1, H), c_n.reshape(1, 1, H))


# --------------------------------------------------------------------------
# Parameter init + pure-JAX reference (for correctness check)
# --------------------------------------------------------------------------
def init_params(key, vocab_size, embedding_dim, hidden_dim):
    ks = jax.random.split(key, 6)
    scale = 0.1
    emb = scale * jax.random.normal(ks[0], (vocab_size, embedding_dim), jnp.float32)
    w_ih = scale * jax.random.normal(ks[1], (embedding_dim, 4 * hidden_dim), jnp.float32)
    w_hh = scale * jax.random.normal(ks[2], (hidden_dim, 4 * hidden_dim), jnp.float32)
    # NOTE: when porting real PyTorch weights, b must be b_ih + b_hh summed.
    b = scale * jax.random.normal(ks[3], (1, 4 * hidden_dim), jnp.float32)
    w_out = scale * jax.random.normal(ks[4], (hidden_dim, vocab_size), jnp.float32)
    b_out = scale * jax.random.normal(ks[5], (1, vocab_size), jnp.float32)
    return emb, w_ih, w_hh, b, w_out, b_out


def _reference(tokens, hidden, params):
    emb, w_ih, w_hh, b, w_out, b_out = params
    H = w_hh.shape[0]
    h = hidden[0].reshape(1, H)
    c = hidden[1].reshape(1, H)
    x = emb[tokens]                                # (L, E)
    xw = x @ w_ih + b                              # (L, 4H), gate order [i,f,g,o]
    hs = []
    for t in range(tokens.shape[0]):
        g = xw[t:t + 1] + h @ w_hh
        i_g = jax.nn.sigmoid(g[:, 0 * H:1 * H])
        f_g = jax.nn.sigmoid(g[:, 1 * H:2 * H])
        g_g = jnp.tanh(g[:, 2 * H:3 * H])
        o_g = jax.nn.sigmoid(g[:, 3 * H:4 * H])
        c = f_g * c + i_g * g_g
        h = o_g * jnp.tanh(c)
        hs.append(h)
    hs = jnp.concatenate(hs, axis=0)
    logits = jnp.maximum(hs @ w_out + b_out, 0.0)
    return jax.nn.log_softmax(logits, axis=1), h, c


if __name__ == "__main__":
    VOCAB, EMB, HID, LENGTH = 64, 16, 32, 8

    key = jax.random.PRNGKey(0)
    k_tok, k_par = jax.random.split(key)
    params = init_params(k_par, VOCAB, EMB, HID)
    tokens = jax.random.randint(k_tok, (LENGTH,), 0, VOCAB, dtype=jnp.int32)

    # initHidden(): zeros (1, 1, hidden_dim)
    h0 = jnp.zeros((1, 1, HID), jnp.float32)
    c0 = jnp.zeros((1, 1, HID), jnp.float32)

    out, (h_n, c_n) = poetry_model_forward(tokens, (h0, c0), params)
    jax.block_until_ready((out, h_n, c_n))

    assert out.shape == (LENGTH, VOCAB)
    assert h_n.shape == (1, 1, HID) and c_n.shape == (1, 1, HID)
    assert bool(jnp.all(jnp.isfinite(out)))
    # log-softmax rows must sum to ~1 in prob space
    assert bool(jnp.allclose(jnp.sum(jnp.exp(out), axis=1), 1.0, atol=1e-3))

    # compare against f32 pure-JAX reference (kernel uses bf16 w_ih/w_out -> loose tol)
    ref_out, ref_h, ref_c = _reference(tokens, (h0, c0), params)
    assert bool(jnp.allclose(out, ref_out, atol=5e-2))
    assert bool(jnp.allclose(h_n.reshape(1, HID), ref_h, atol=5e-2))
    assert bool(jnp.allclose(c_n.reshape(1, HID), ref_c, atol=5e-2))

    print("KERNEL_OK")
</pallas_src>

<mosaic_0001>
module attributes {stable_mosaic.version = 11 : i64} {
  func.func @_lstm_kernel(%arg0: memref<8x16xf32, #tpu.memory_space<vmem>>, %arg1: memref<16x128xbf16, #tpu.memory_space<vmem>>, %arg2: memref<32x128xf32, #tpu.memory_space<vmem>>, %arg3: memref<1x128xf32, #tpu.memory_space<vmem>>, %arg4: memref<1x32xf32, #tpu.memory_space<vmem>>, %arg5: memref<1x32xf32, #tpu.memory_space<vmem>>, %arg6: memref<8x32xf32, #tpu.memory_space<vmem>>, %arg7: memref<1x32xf32, #tpu.memory_space<vmem>>, %arg8: memref<1x32xf32, #tpu.memory_space<vmem>>, %arg9: memref<8x128xf32, #tpu.memory_space<vmem>>) attributes {dimension_semantics = [], scalar_prefetch = 0 : i64, scratch_operands = 1 : i64, tpu.core_type = #tpu.core_type<tc>} {
    %c0 = arith.constant 0 : index
    %c0_0 = arith.constant 0 : index
    %0 = vector.load %arg0[%c0, %c0_0] : memref<8x16xf32, #tpu.memory_space<vmem>>, vector<8x16xf32>
    %1 = arith.truncf %0 : vector<8x16xf32> to vector<8x16xbf16>
    %c0_1 = arith.constant 0 : index
    %c0_2 = arith.constant 0 : index
    %2 = vector.load %arg1[%c0_1, %c0_2] : memref<16x128xbf16, #tpu.memory_space<vmem>>, vector<16x128xbf16>
    %cst = arith.constant dense<0.000000e+00> : vector<8x128xf32>
    %3 = tpu.matmul %1, %2, %cst {dimension_numbers = #tpu.dot_dimension_numbers<[1], [0], [0], [1], [0, 0, 1, 1], [], []>} : vector<8x16xbf16>, vector<16x128xbf16>, vector<8x128xf32> -> vector<8x128xf32>
    %c0_3 = arith.constant 0 : index
    %c0_4 = arith.constant 0 : index
    %4 = vector.load %arg3[%c0_3, %c0_4] : memref<1x128xf32, #tpu.memory_space<vmem>>, vector<1x128xf32>
    %5 = vector.broadcast %4 : vector<1x128xf32> to vector<8x128xf32>
    %6 = arith.addf %3, %5 : vector<8x128xf32>
    %c0_5 = arith.constant 0 : index
    %c0_6 = arith.constant 0 : index
    %7 = vector.load %arg9[%c0_5, %c0_6] : memref<8x128xf32, #tpu.memory_space<vmem>>, vector<8x128xf32>
    tpu.vector_store %arg9[%c0_5, %c0_6], %6 {strides = array<i32>} : memref<8x128xf32, #tpu.memory_space<vmem>>, vector<8x128xf32>,
    %c0_7 = arith.constant 0 : index
    %c0_8 = arith.constant 0 : index
    %8 = vector.load %arg4[%c0_7, %c0_8] : memref<1x32xf32, #tpu.memory_space<vmem>>, vector<1x32xf32>
    %c0_9 = arith.constant 0 : index
    %c0_10 = arith.constant 0 : index
    %9 = vector.load %arg5[%c0_9, %c0_10] : memref<1x32xf32, #tpu.memory_space<vmem>>, vector<1x32xf32>
    %c0_i32 = arith.constant 0 : i32
    %10 = arith.index_cast %c0_i32 : i32 to index
    %c0_11 = arith.constant 0 : index
    %11 = vector.load %arg9[%10, %c0_11] : memref<8x128xf32, #tpu.memory_space<vmem>>, vector<1x128xf32>
    %c0_12 = arith.constant 0 : index
    %c0_13 = arith.constant 0 : index
    %12 = vector.load %arg2[%c0_12, %c0_13] : memref<32x128xf32, #tpu.memory_space<vmem>>, vector<32x128xf32>
    %cst_14 = arith.constant dense<0.000000e+00> : vector<1x128xf32>
    %13 = tpu.matmul %8, %12, %cst_14 {dimension_numbers = #tpu.dot_dimension_numbers<[1], [0], [0], [1], [0, 0, 1, 1], [], []>} : vector<1x32xf32>, vector<32x128xf32>, vector<1x128xf32> -> vector<1x128xf32>
    %14 = arith.addf %11, %13 : vector<1x128xf32>
    %15 = vector.extract_strided_slice %14 {offsets = [0, 0], sizes = [1, 96], strides = [1, 1]} : vector<1x128xf32> to vector<1x96xf32>
    %16 = arith.negf %15 : vector<1x96xf32>
    %17 = math.exp %16 : vector<1x96xf32>
    %cst_15 = arith.constant 1.000000e+00 : f32
    %18 = vector.broadcast %cst_15 : f32 to vector<1x96xf32>
    %19 = arith.addf %18, %17 : vector<1x96xf32>
    %20 = arith.divf %18, %19 : vector<1x96xf32>
    %21 = vector.extract_strided_slice %14 {offsets = [0, 96], sizes = [1, 32], strides = [1, 1]} : vector<1x128xf32> to vector<1x32xf32>
    %22 = math.tanh %21 : vector<1x32xf32>
    %23 = vector.extract_strided_slice %20 {offsets = [0, 0], sizes = [1, 32], strides = [1, 1]} : vector<1x96xf32> to vector<1x32xf32>
    %24 = vector.extract_strided_slice %20 {offsets = [0, 32], sizes = [1, 32], strides = [1, 1]} : vector<1x96xf32> to vector<1x32xf32>
    %25 = vector.extract_strided_slice %20 {offsets = [0, 64], sizes = [1, 32], strides = [1, 1]} : vector<1x96xf32> to vector<1x32xf32>
    %26 = arith.mulf %24, %9 : vector<1x32xf32>
    %27 = arith.mulf %23, %22 : vector<1x32xf32>
    %28 = arith.addf %26, %27 : vector<1x32xf32>
    %29 = math.tanh %28 : vector<1x32xf32>
    %30 = arith.mulf %25, %29 : vector<1x32xf32>
    %31 = arith.index_cast %c0_i32 : i32 to index
    %c0_16 = arith.constant 0 : index
    %32 = vector.load %arg6[%31, %c0_16] : memref<8x32xf32, #tpu.memory_space<vmem>>, vector<1x32xf32>
    tpu.vector_store %arg6[%31, %c0_16], %30 {strides = array<i32>} : memref<8x32xf32, #tpu.memory_space<vmem>>, vector<1x32xf32>,
    %c1_i32 = arith.constant 1 : i32
    %33 = arith.index_cast %c1_i32 : i32 to index
    %c0_17 = arith.constant 0 : index
    %34 = vector.load %arg9[%33, %c0_17] : memref<8x128xf32, #tpu.memory_space<vmem>>, vector<1x128xf32>
    %c0_18 = arith.constant 0 : index
    %c0_19 = arith.constant 0 : index
    %35 = vector.load %arg2[%c0_18, %c0_19] : memref<32x128xf32, #tpu.memory_space<vmem>>, vector<32x128xf32>
    %cst_20 = arith.constant dense<0.000000e+00> : vector<1x128xf32>
    %36 = tpu.matmul %30, %35, %cst_20 {dimension_numbers = #tpu.dot_dimension_numbers<[1], [0], [0], [1], [0, 0, 1, 1], [], []>} : vector<1x32xf32>, vector<32x128xf32>, vector<1x128xf32> -> vector<1x128xf32>
    %37 = arith.addf %34, %36 : vector<1x128xf32>
    %38 = vector.extract_strided_slice %37 {offsets = [0, 0], sizes = [1, 96], strides = [1, 1]} : vector<1x128xf32> to vector<1x96xf32>
    %39 = arith.negf %38 : vector<1x96xf32>
    %40 = math.exp %39 : vector<1x96xf32>
    %cst_21 = arith.constant 1.000000e+00 : f32
    %41 = vector.broadcast %cst_21 : f32 to vector<1x96xf32>
    %42 = arith.addf %41, %40 : vector<1x96xf32>
    %43 = arith.divf %41, %42 : vector<1x96xf32>
    %44 = vector.extract_strided_slice %37 {offsets = [0, 96], sizes = [1, 32], strides = [1, 1]} : vector<1x128xf32> to vector<1x32xf32>
    %45 = math.tanh %44 : vector<1x32xf32>
    %46 = vector.extract_strided_slice %43 {offsets = [0, 0], sizes = [1, 32], strides = [1, 1]} : vector<1x96xf32> to vector<1x32xf32>
    %47 = vector.extract_strided_slice %43 {offsets = [0, 32], sizes = [1, 32], strides = [1, 1]} : vector<1x96xf32> to vector<1x32xf32>
    %48 = vector.extract_strided_slice %43 {offsets = [0, 64], sizes = [1, 32], strides = [1, 1]} : vector<1x96xf32> to vector<1x32xf32>
    %49 = arith.mulf %47, %28 : vector<1x32xf32>
    %50 = arith.mulf %46, %45 : vector<1x32xf32>
    %51 = arith.addf %49, %50 : vector<1x32xf32>
    %52 = math.tanh %51 : vector<1x32xf32>
    %53 = arith.mulf %48, %52 : vector<1x32xf32>
    %54 = arith.index_cast %c1_i32 : i32 to index
    %c0_22 = arith.constant 0 : index
    %55 = vector.load %arg6[%54, %c0_22] : memref<8x32xf32, #tpu.memory_space<vmem>>, vector<1x32xf32>
    tpu.vector_store %arg6[%54, %c0_22], %53 {strides = array<i32>} : memref<8x32xf32, #tpu.memory_space<vmem>>, vector<1x32xf32>,
    %c2_i32 = arith.constant 2 : i32
    %56 = arith.index_cast %c2_i32 : i32 to index
    %c0_23 = arith.constant 0 : index
    %57 = vector.load %arg9[%56, %c0_23] : memref<8x128xf32, #tpu.memory_space<vmem>>, vector<1x128xf32>
    %c0_24 = arith.constant 0 : index
    %c0_25 = arith.constant 0 : index
    %58 = vector.load %arg2[%c0_24, %c0_25] : memref<32x128xf32, #tpu.memory_space<vmem>>, vector<32x128xf32>
    %cst_26 = arith.constant dense<0.000000e+00> : vector<1x128xf32>
    %59 = tpu.matmul %53, %58, %cst_26 {dimension_numbers = #tpu.dot_dimension_numbers<[1], [0], [0], [1], [0, 0, 1, 1], [], []>} : vector<1x32xf32>, vector<32x128xf32>, vector<1x128xf32> -> vector<1x128xf32>
    %60 = arith.addf %57, %59 : vector<1x128xf32>
    %61 = vector.extract_strided_slice %60 {offsets = [0, 0], sizes = [1, 96], strides = [1, 1]} : vector<1x128xf32> to vector<1x96xf32>
    %62 = arith.negf %61 : vector<1x96xf32>
    %63 = math.exp %62 : vector<1x96xf32>
    %cst_27 = arith.constant 1.000000e+00 : f32
    %64 = vector.broadcast %cst_27 : f32 to vector<1x96xf32>
    %65 = arith.addf %64, %63 : vector<1x96xf32>
    %66 = arith.divf %64, %65 : vector<1x96xf32>
    %67 = vector.extract_strided_slice %60 {offsets = [0, 96], sizes = [1, 32], strides = [1, 1]} : vector<1x128xf32> to vector<1x32xf32>
    %68 = math.tanh %67 : vector<1x32xf32>
    %69 = vector.extract_strided_slice %66 {offsets = [0, 0], sizes = [1, 32], strides = [1, 1]} : vector<1x96xf32> to vector<1x32xf32>
    %70 = vector.extract_strided_slice %66 {offsets = [0, 32], sizes = [1, 32], strides = [1, 1]} : vector<1x96xf32> to vector<1x32xf32>
    %71 = vector.extract_strided_slice %66 {offsets = [0, 64], sizes = [1, 32], strides = [1, 1]} : vector<1x96xf32> to vector<1x32xf32>
    %72 = arith.mulf %70, %51 : vector<1x32xf32>
    %73 = arith.mulf %69, %68 : vector<1x32xf32>
    %74 = arith.addf %72, %73 : vector<1x32xf32>
    %75 = math.tanh %74 : vector<1x32xf32>
    %76 = arith.mulf %71, %75 : vector<1x32xf32>
    %77 = arith.index_cast %c2_i32 : i32 to index
    %c0_28 = arith.constant 0 : index
    %78 = vector.load %arg6[%77, %c0_28] : memref<8x32xf32, #tpu.memory_space<vmem>>, vector<1x32xf32>
    tpu.vector_store %arg6[%77, %c0_28], %76 {strides = array<i32>} : memref<8x32xf32, #tpu.memory_space<vmem>>, vector<1x32xf32>,
    %c3_i32 = arith.constant 3 : i32
    %79 = arith.index_cast %c3_i32 : i32 to index
    %c0_29 = arith.constant 0 : index
    %80 = vector.load %arg9[%79, %c0_29] : memref<8x128xf32, #tpu.memory_space<vmem>>, vector<1x128xf32>
    %c0_30 = arith.constant 0 : index
    %c0_31 = arith.constant 0 : index
    %81 = vector.load %arg2[%c0_30, %c0_31] : memref<32x128xf32, #tpu.memory_space<vmem>>, vector<32x128xf32>
    %cst_32 = arith.constant dense<0.000000e+00> : vector<1x128xf32>
    %82 = tpu.matmul %76, %81, %cst_32 {dimension_numbers = #tpu.dot_dimension_numbers<[1], [0], [0], [1], [0, 0, 1, 1], [], []>} : vector<1x32xf32>, vector<32x128xf32>, vector<1x128xf32> -> vector<1x128xf32>
    %83 = arith.addf %80, %82 : vector<1x128xf32>
    %84 = vector.extract_strided_slice %83 {offsets = [0, 0], sizes = [1, 96], strides = [1, 1]} : vector<1x128xf32> to vector<1x96xf32>
    %85 = arith.negf %84 : vector<1x96xf32>
    %86 = math.exp %85 : vector<1x96xf32>
    %cst_33 = arith.constant 1.000000e+00 : f32
    %87 = vector.broadcast %cst_33 : f32 to vector<1x96xf32>
    %88 = arith.addf %87, %86 : vector<1x96xf32>
    %89 = arith.divf %87, %88 : vector<1x96xf32>
    %90 = vector.extract_strided_slice %83 {offsets = [0, 96], sizes = [1, 32], strides = [1, 1]} : vector<1x128xf32> to vector<1x32xf32>
    %91 = math.tanh %90 : vector<1x32xf32>
    %92 = vector.extract_strided_slice %89 {offsets = [0, 0], sizes = [1, 32], strides = [1, 1]} : vector<1x96xf32> to vector<1x32xf32>
    %93 = vector.extract_strided_slice %89 {offsets = [0, 32], sizes = [1, 32], strides = [1, 1]} : vector<1x96xf32> to vector<1x32xf32>
    %94 = vector.extract_strided_slice %89 {offsets = [0, 64], sizes = [1, 32], strides = [1, 1]} : vector<1x96xf32> to vector<1x32xf32>
    %95 = arith.mulf %93, %74 : vector<1x32xf32>
    %96 = arith.mulf %92, %91 : vector<1x32xf32>
    %97 = arith.addf %95, %96 : vector<1x32xf32>
    %98 = math.tanh %97 : vector<1x32xf32>
    %99 = arith.mulf %94, %98 : vector<1x32xf32>
    %100 = arith.index_cast %c3_i32 : i32 to index
    %c0_34 = arith.constant 0 : index
    %101 = vector.load %arg6[%100, %c0_34] : memref<8x32xf32, #tpu.memory_space<vmem>>, vector<1x32xf32>
    tpu.vector_store %arg6[%100, %c0_34], %99 {strides = array<i32>} : memref<8x32xf32, #tpu.memory_space<vmem>>, vector<1x32xf32>,
    %c4_i32 = arith.constant 4 : i32
    %102 = arith.index_cast %c4_i32 : i32 to index
    %c0_35 = arith.constant 0 : index
    %103 = vector.load %arg9[%102, %c0_35] : memref<8x128xf32, #tpu.memory_space<vmem>>, vector<1x128xf32>
    %c0_36 = arith.constant 0 : index
    %c0_37 = arith.constant 0 : index
    %104 = vector.load %arg2[%c0_36, %c0_37] : memref<32x128xf32, #tpu.memory_space<vmem>>, vector<32x128xf32>
    %cst_38 = arith.constant dense<0.000000e+00> : vector<1x128xf32>
    %105 = tpu.matmul %99, %104, %cst_38 {dimension_numbers = #tpu.dot_dimension_numbers<[1], [0], [0], [1], [0, 0, 1, 1], [], []>} : vector<1x32xf32>, vector<32x128xf32>, vector<1x128xf32> -> vector<1x128xf32>
    %106 = arith.addf %103, %105 : vector<1x128xf32>
    %107 = vector.extract_strided_slice %106 {offsets = [0, 0], sizes = [1, 96], strides = [1, 1]} : vector<1x128xf32> to vector<1x96xf32>
    %108 = arith.negf %107 : vector<1x96xf32>
    %109 = math.exp %108 : vector<1x96xf32>
    %cst_39 = arith.constant 1.000000e+00 : f32
    %110 = vector.broadcast %cst_39 : f32 to vector<1x96xf32>
    %111 = arith.addf %110, %109 : vector<1x96xf32>
    %112 = arith.divf %110, %111 : vector<1x96xf32>
    %113 = vector.extract_strided_slice %106 {offsets = [0, 96], sizes = [1, 32], strides = [1, 1]} : vector<1x128xf32> to vector<1x32xf32>
    %114 = math.tanh %113 : vector<1x32xf32>
    %115 = vector.extract_strided_slice %112 {offsets = [0, 0], sizes = [1, 32], strides = [1, 1]} : vector<1x96xf32> to vector<1x32xf32>
    %116 = vector.extract_strided_slice %112 {offsets = [0, 32], sizes = [1, 32], strides = [1, 1]} : vector<1x96xf32> to vector<1x32xf32>
    %117 = vector.extract_strided_slice %112 {offsets = [0, 64], sizes = [1, 32], strides = [1, 1]} : vector<1x96xf32> to vector<1x32xf32>
    %118 = arith.mulf %116, %97 : vector<1x32xf32>
    %119 = arith.mulf %115, %114 : vector<1x32xf32>
    %120 = arith.addf %118, %119 : vector<1x32xf32>
    %121 = math.tanh %120 : vector<1x32xf32>
    %122 = arith.mulf %117, %121 : vector<1x32xf32>
    %123 = arith.index_cast %c4_i32 : i32 to index
    %c0_40 = arith.constant 0 : index
    %124 = vector.load %arg6[%123, %c0_40] : memref<8x32xf32, #tpu.memory_space<vmem>>, vector<1x32xf32>
    tpu.vector_store %arg6[%123, %c0_40], %122 {strides = array<i32>} : memref<8x32xf32, #tpu.memory_space<vmem>>, vector<1x32xf32>,
    %c5_i32 = arith.constant 5 : i32
    %125 = arith.index_cast %c5_i32 : i32 to index
    %c0_41 = arith.constant 0 : index
    %126 = vector.load %arg9[%125, %c0_41] : memref<8x128xf32, #tpu.memory_space<vmem>>, vector<1x128xf32>
    %c0_42 = arith.constant 0 : index
    %c0_43 = arith.constant 0 : index
    %127 = vector.load %arg2[%c0_42, %c0_43] : memref<32x128xf32, #tpu.memory_space<vmem>>, vector<32x128xf32>
    %cst_44 = arith.constant dense<0.000000e+00> : vector<1x128xf32>
    %128 = tpu.matmul %122, %127, %cst_44 {dimension_numbers = #tpu.dot_dimension_numbers<[1], [0], [0], [1], [0, 0, 1, 1], [], []>} : vector<1x32xf32>, vector<32x128xf32>, vector<1x128xf32> -> vector<1x128xf32>
    %129 = arith.addf %126, %128 : vector<1x128xf32>
    %130 = vector.extract_strided_slice %129 {offsets = [0, 0], sizes = [1, 96], strides = [1, 1]} : vector<1x128xf32> to vector<1x96xf32>
    %131 = arith.negf %130 : vector<1x96xf32>
    %132 = math.exp %131 : vector<1x96xf32>
    %cst_45 = arith.constant 1.000000e+00 : f32
    %133 = vector.broadcast %cst_45 : f32 to vector<1x96xf32>
    %134 = arith.addf %133, %132 : vector<1x96xf32>
    %135 = arith.divf %133, %134 : vector<1x96xf32>
    %136 = vector.extract_strided_slice %129 {offsets = [0, 96], sizes = [1, 32], strides = [1, 1]} : vector<1x128xf32> to vector<1x32xf32>
    %137 = math.tanh %136 : vector<1x32xf32>
    %138 = vector.extract_strided_slice %135 {offsets = [0, 0], sizes = [1, 32], strides = [1, 1]} : vector<1x96xf32> to vector<1x32xf32>
    %139 = vector.extract_strided_slice %135 {offsets = [0, 32], sizes = [1, 32], strides = [1, 1]} : vector<1x96xf32> to vector<1x32xf32>
    %140 = vector.extract_strided_slice %135 {offsets = [0, 64], sizes = [1, 32], strides = [1, 1]} : vector<1x96xf32> to vector<1x32xf32>
    %141 = arith.mulf %139, %120 : vector<1x32xf32>
    %142 = arith.mulf %138, %137 : vector<1x32xf32>
    %143 = arith.addf %141, %142 : vector<1x32xf32>
    %144 = math.tanh %143 : vector<1x32xf32>
    %145 = arith.mulf %140, %144 : vector<1x32xf32>
    %146 = arith.index_cast %c5_i32 : i32 to index
    %c0_46 = arith.constant 0 : index
    %147 = vector.load %arg6[%146, %c0_46] : memref<8x32xf32, #tpu.memory_space<vmem>>, vector<1x32xf32>
    tpu.vector_store %arg6[%146, %c0_46], %145 {strides = array<i32>} : memref<8x32xf32, #tpu.memory_space<vmem>>, vector<1x32xf32>,
    %c6_i32 = arith.constant 6 : i32
    %148 = arith.index_cast %c6_i32 : i32 to index
    %c0_47 = arith.constant 0 : index
    %149 = vector.load %arg9[%148, %c0_47] : memref<8x128xf32, #tpu.memory_space<vmem>>, vector<1x128xf32>
    %c0_48 = arith.constant 0 : index
    %c0_49 = arith.constant 0 : index
    %150 = vector.load %arg2[%c0_48, %c0_49] : memref<32x128xf32, #tpu.memory_space<vmem>>, vector<32x128xf32>
    %cst_50 = arith.constant dense<0.000000e+00> : vector<1x128xf32>
    %151 = tpu.matmul %145, %150, %cst_50 {dimension_numbers = #tpu.dot_dimension_numbers<[1], [0], [0], [1], [0, 0, 1, 1], [], []>} : vector<1x32xf32>, vector<32x128xf32>, vector<1x128xf32> -> vector<1x128xf32>
    %152 = arith.addf %149, %151 : vector<1x128xf32>
    %153 = vector.extract_strided_slice %152 {offsets = [0, 0], sizes = [1, 96], strides = [1, 1]} : vector<1x128xf32> to vector<1x96xf32>
    %154 = arith.negf %153 : vector<1x96xf32>
    %155 = math.exp %154 : vector<1x96xf32>
    %cst_51 = arith.constant 1.000000e+00 : f32
    %156 = vector.broadcast %cst_51 : f32 to vector<1x96xf32>
    %157 = arith.addf %156, %155 : vector<1x96xf32>
    %158 = arith.divf %156, %157 : vector<1x96xf32>
    %159 = vector.extract_strided_slice %152 {offsets = [0, 96], sizes = [1, 32], strides = [1, 1]} : vector<1x128xf32> to vector<1x32xf32>
    %160 = math.tanh %159 : vector<1x32xf32>
    %161 = vector.extract_strided_slice %158 {offsets = [0, 0], sizes = [1, 32], strides = [1, 1]} : vector<1x96xf32> to vector<1x32xf32>
    %162 = vector.extract_strided_slice %158 {offsets = [0, 32], sizes = [1, 32], strides = [1, 1]} : vector<1x96xf32> to vector<1x32xf32>
    %163 = vector.extract_strided_slice %158 {offsets = [0, 64], sizes = [1, 32], strides = [1, 1]} : vector<1x96xf32> to vector<1x32xf32>
    %164 = arith.mulf %162, %143 : vector<1x32xf32>
    %165 = arith.mulf %161, %160 : vector<1x32xf32>
    %166 = arith.addf %164, %165 : vector<1x32xf32>
    %167 = math.tanh %166 : vector<1x32xf32>
    %168 = arith.mulf %163, %167 : vector<1x32xf32>
    %169 = arith.index_cast %c6_i32 : i32 to index
    %c0_52 = arith.constant 0 : index
    %170 = vector.load %arg6[%169, %c0_52] : memref<8x32xf32, #tpu.memory_space<vmem>>, vector<1x32xf32>
    tpu.vector_store %arg6[%169, %c0_52], %168 {strides = array<i32>} : memref<8x32xf32, #tpu.memory_space<vmem>>, vector<1x32xf32>,
    %c7_i32 = arith.constant 7 : i32
    %171 = arith.index_cast %c7_i32 : i32 to index
    %c0_53 = arith.constant 0 : index
    %172 = vector.load %arg9[%171, %c0_53] : memref<8x128xf32, #tpu.memory_space<vmem>>, vector<1x128xf32>
    %c0_54 = arith.constant 0 : index
    %c0_55 = arith.constant 0 : index
    %173 = vector.load %arg2[%c0_54, %c0_55] : memref<32x128xf32, #tpu.memory_space<vmem>>, vector<32x128xf32>
    %cst_56 = arith.constant dense<0.000000e+00> : vector<1x128xf32>
    %174 = tpu.matmul %168, %173, %cst_56 {dimension_numbers = #tpu.dot_dimension_numbers<[1], [0], [0], [1], [0, 0, 1, 1], [], []>} : vector<1x32xf32>, vector<32x128xf32>, vector<1x128xf32> -> vector<1x128xf32>
    %175 = arith.addf %172, %174 : vector<1x128xf32>
    %176 = vector.extract_strided_slice %175 {offsets = [0, 0], sizes = [1, 96], strides = [1, 1]} : vector<1x128xf32> to vector<1x96xf32>
    %177 = arith.negf %176 : vector<1x96xf32>
    %178 = math.exp %177 : vector<1x96xf32>
    %cst_57 = arith.constant 1.000000e+00 : f32
    %179 = vector.broadcast %cst_57 : f32 to vector<1x96xf32>
    %180 = arith.addf %179, %178 : vector<1x96xf32>
    %181 = arith.divf %179, %180 : vector<1x96xf32>
    %182 = vector.extract_strided_slice %175 {offsets = [0, 96], sizes = [1, 32], strides = [1, 1]} : vector<1x128xf32> to vector<1x32xf32>
    %183 = math.tanh %182 : vector<1x32xf32>
    %184 = vector.extract_strided_slice %181 {offsets = [0, 0], sizes = [1, 32], strides = [1, 1]} : vector<1x96xf32> to vector<1x32xf32>
    %185 = vector.extract_strided_slice %181 {offsets = [0, 32], sizes = [1, 32], strides = [1, 1]} : vector<1x96xf32> to vector<1x32xf32>
    %186 = vector.extract_strided_slice %181 {offsets = [0, 64], sizes = [1, 32], strides = [1, 1]} : vector<1x96xf32> to vector<1x32xf32>
    %187 = arith.mulf %185, %166 : vector<1x32xf32>
    %188 = arith.mulf %184, %183 : vector<1x32xf32>
    %189 = arith.addf %187, %188 : vector<1x32xf32>
    %190 = math.tanh %189 : vector<1x32xf32>
    %191 = arith.mulf %186, %190 : vector<1x32xf32>
    %192 = arith.index_cast %c7_i32 : i32 to index
    %c0_58 = arith.constant 0 : index
    %193 = vector.load %arg6[%192, %c0_58] : memref<8x32xf32, #tpu.memory_space<vmem>>, vector<1x32xf32>
    tpu.vector_store %arg6[%192, %c0_58], %191 {strides = array<i32>} : memref<8x32xf32, #tpu.memory_space<vmem>>, vector<1x32xf32>,
    %c8_i32 = arith.constant 8 : i32
    %c0_59 = arith.constant 0 : index
    %c0_60 = arith.constant 0 : index
    %194 = vector.load %arg7[%c0_59, %c0_60] : memref<1x32xf32, #tpu.memory_space<vmem>>, vector<1x32xf32>
    tpu.vector_store %arg7[%c0_59, %c0_60], %191 {strides = array<i32>} : memref<1x32xf32, #tpu.memory_space<vmem>>, vector<1x32xf32>,
    %c0_61 = arith.constant 0 : index
    %c0_62 = arith.constant 0 : index
    %195 = vector.load %arg8[%c0_61, %c0_62] : memref<1x32xf32, #tpu.memory_space<vmem>>, vector<1x32xf32>
    tpu.vector_store %arg8[%c0_61, %c0_62], %189 {strides = array<i32>} : memref<1x32xf32, #tpu.memory_space<vmem>>, vector<1x32xf32>,
    return
  }
}

</mosaic_0001>

<bundles_post_ra>
// kernel: tpu_custom_call.1
= control target key start
LH: loop header
LB: loop body
LE: loop exit
PB: predicated region body
PF: predicated region fallthrough
CT: control target
= control target key end

     0   :  { %14 = vsyncpa [#allocation4], 0  ;;  %s1736_s0 = inlined_call_operand.hbm [shape: f32[8,16], index: 0, kind: input, shape index: {}]   ;;  %s1737_s1 = inlined_call_operand.hbm [shape: bf16[16,128], index: 1, kind: input, shape index: {}]   ;;  %s1738_s2 = inlined_call_operand.hbm [shape: f32[32,128], index: 2, kind: input, shape index: {}]   ;;  %s1739_s3 = inlined_call_operand.vmem [shape: f32[1,128], index: 3, kind: input, shape index: {}]   ;;  %s1740_s4 = inlined_call_operand.vmem [shape: f32[1,32], index: 4, kind: input, shape index: {}]   ;;  %s1741_s5 = inlined_call_operand.vmem [shape: f32[1,32], index: 5, kind: input, shape index: {}]   ;;  %s1742_s6 = inlined_call_operand.hbm [shape: f32[8,32], index: 6, kind: output, shape index: {0}]   ;;  %s1743_s7 = inlined_call_operand.hbm [shape: f32[1,32], index: 7, kind: output, shape index: {1}]   ;;  %s1744_s8 = inlined_call_operand.hbm [shape: f32[1,32], index: 8, kind: output, shape index: {2}]  }
   0x1   :  { %15 = vsyncpa [#allocation7], 0 }
   0x2   :  { %16 = vsyncpa [#allocation5], 0 }
   0x3   :  { %17 = vsyncpa [#allocation11], 0  ;;  %s1472_s27 = smov [#allocation6]   ;;  %s1332_s9 = scalar_lea.hbm %s1737_s1, 128 }
   0x4   :  { %s33_s28 = sshll.u32 %s1472_s27, 4  ;;  %p1333_p0 = scmp.ne.s32.totalorder %s1737_s1, %s1332_s9  ;;  %s34_s28 = int_to_ptr.vmem [resolvable:$true] %s33_s28 }
   0x5   :  { %p1336_p1 = scmp.lt.u32.totalorder %s1332_s9, %s1737_s1 }
   0x7   :  { %p1338_p2 = pnand %p1336_p1, %p1333_p0 }
   0x9   :  { %1341 = shalt.err (!%p1338_p2)
}
   0xa   :  { %s1342_s14 = scalar_lea.vmem %s34_s28, 128  ;;  %p1347_p4 = scmp.lt.s32.totalorder %s34_s28, %s34_s28 }
   0xb   :  { %p1343_p3 = scmp.ne.s32.totalorder %s34_s28, %s1342_s14  ;;  %p1348_p5 = scmp.lt.s32.totalorder %s1342_s14, %s1342_s14 }
   0xd   :  { %p1349_p6 = por %p1348_p5, %p1347_p4 }
   0xf   :  { %p1350_p7 = pnand %p1349_p6, %p1343_p3 }
  0x11   :  { %1353 = shalt.err (!%p1350_p7)
}
  0x12   :  { %s1473_s15 = smov 64   ;;  %s1474_s16 = smov 4  }
  0x13   :  { %39 = dma.hbm_to_vmem [thread:$0]  %s1737_s1, 128, %s34_s28, [#allocation7], %s1473_s15, %s1473_s15, %s1474_s16  }
  0x14   :  { %s1475_s19 = smov [#allocation3]   ;;  %s1476_s21 = smov [#allocation8]  }
  0x15   :  { %s24_s20 = sshll.u32 %s1475_s19, 4  ;;  %s45_s22 = sshll.u32 %s1476_s21, 4  ;;  %s25_s20 = int_to_ptr.vmem [resolvable:$true] %s24_s20  ;;  %s46_s22 = int_to_ptr.vmem [resolvable:$true] %s45_s22 }
  0x16   :  { %s1354_s25 = scalar_lea.hbm %s1736_s0, 128 }
  0x17   :  { %p1355_p8 = scmp.ne.s32.totalorder %s1736_s0, %s1354_s25  ;;  %p1358_p9 = scmp.lt.u32.totalorder %s1354_s25, %s1736_s0 }
  0x19   :  { %p1360_p10 = pnand %p1358_p9, %p1355_p8 }
  0x1b   :  { %1363 = shalt.err (!%p1360_p10)
}
  0x1c   :  { %s1364_s1 = scalar_lea.vmem %s25_s20, 128  ;;  %p1369_p12 = scmp.lt.s32.totalorder %s25_s20, %s25_s20 }
  0x1d   :  { %p1365_p11 = scmp.ne.s32.totalorder %s25_s20, %s1364_s1  ;;  %p1370_p13 = scmp.lt.s32.totalorder %s1364_s1, %s1364_s1 }
  0x1f   :  { %p1371_p0 = por %p1370_p13, %p1369_p12 }
  0x21   :  { %p1372_p1 = pnand %p1371_p0, %p1365_p11 }
  0x23   :  { %1375 = shalt.err (!%p1372_p1)
}
  0x24   :  { %27 = dma.hbm_to_vmem [thread:$0]  %s1736_s0, 128, %s25_s20, [#allocation4]  }
  0x25   :  { %s1376_s12 = scalar_lea.hbm %s1738_s2, 512 }
  0x26   :  { %p1377_p2 = scmp.ne.s32.totalorder %s1738_s2, %s1376_s12  ;;  %p1380_p3 = scmp.lt.u32.totalorder %s1376_s12, %s1738_s2 }
  0x28   :  { %p1382_p4 = pnand %p1380_p3, %p1377_p2 }
  0x2a   :  { %1385 = shalt.err (!%p1382_p4)
}
  0x2b   :  { %s1386_s18 = scalar_lea.vmem %s46_s22, 512  ;;  %p1391_p6 = scmp.lt.s32.totalorder %s46_s22, %s46_s22 }
  0x2c   :  { %p1387_p5 = scmp.ne.s32.totalorder %s46_s22, %s1386_s18  ;;  %p1392_p7 = scmp.lt.s32.totalorder %s1386_s18, %s1386_s18 }
  0x2e   :  { %p1393_p8 = por %p1392_p7, %p1391_p6 }
  0x30   :  { %p1394_p9 = pnand %p1393_p8, %p1387_p5 }
  0x32   :  { %1397 = shalt.err (!%p1394_p9)
}
  0x33   :  { %s1477_s0 = smov 128   ;;  %s1478_s19 = smov 8  }
  0x34   :  { %51 = dma.hbm_to_vmem [thread:$0]  %s1738_s2, 512, %s46_s22, [#allocation7], %s1477_s0, %s1477_s0, %s1478_s19  }
  0x35   :  { %1464 = dma.done.wait [#allocation4], 128  }
  0x36   :  { %1465 = vsyncadd [#allocation4], 4294967168 }
  0x37   :  { %1466 = dma.done.wait [#allocation7], 640  }
  0x38   :  { %1467 = vsyncadd [#allocation7], 4294966656  ;;  %v1479_v0 = vmov 0.0   ;;  %vm1480_vm0 = vmmov 0   ;;  %v1481_v1 = vmov 0.0|0.0   ;;  %v1267_v2 = vld [vmem:[#allocation6] sm:$0xff]  }
  0x39   :  { %1110 = vmatprep.subr.bf16.mxu0 %v1479_v0  ;;  %1112 = vmatprep.mubr.msk.bf16.mxu0 %vm1480_vm0, %v1479_v0  ;;  %v68_v3 = vld [vmem:[#allocation3] sm:$0xff]  ;;  %v133_v4 = vld [vmem:[#allocation8] sm:$0xff]  ;;  %v134_v5 = vld [vmem:[#allocation8 + $0x8] sm:$0xff]  ;;  %vm85_vm1 = vcmask 130048   ;;  %vm137_vm2 = vcmask 261120   ;;  %s1482_s24 = smov 32  }
  0x3a   :  { %1204 = vmatprep.subr.bf16.mxu1 %v1481_v1  ;;  %1124 = vmatprep.mubr.msk.f32.mxu1 %vm1480_vm0, %v1479_v0  ;;  %v69_v6 = vpack.c.bf16 %v68_v3, %v68_v3  ;;  %v1576_v7 = vpack.c.bf16 %v134_v5, %v133_v4  ;;  %v135_v8 = vld [vmem:[#allocation8 + $0x10] sm:$0xff]  ;;  %v136_v9 = vld [vmem:[#allocation8 + $0x18] sm:$0xff]  ;;  %v130_v11 = vld [vmem:[%s1740_s4] sm:$0x1]  ;;  %vm248_vm3 = vcmask 253952   ;;  %s1485_s29 = smov [#allocation9]  }
  0x3b   :  { %1111 = vmatpush3.bf16.msra.mxu0 %v1267_v2  ;;  %v1580_v10 = vpack.c.bf16 %v136_v9, %v135_v8  ;;  %v1048_v12 = vld [vmem:[%s1739_s3] ss:$0 sm:$0xff]  ;;  %s1483_s3 = smov 96   ;;  %s1011_s30 = sshll.u32 %s1485_s29, 4  ;;  %s1683_s30 = int_to_ptr.vmem [resolvable:$true] %s1011_s30 }
  0x3c   :  { %1210 = vmatprep.subr.bf16.mxu0 %v1481_v1  ;;  %1206 = vmatpush3.bf16.msra.mxu1 %v1576_v7  ;;  %v1053_v23 = vld [vmem:[%s1741_s5] ss:$0 sm:$0xff]  ;;  %s1484_s5 = smov [#allocation10]   ;;  %s1486_s1 = smov [#allocation12]  }
  0x3d   :  { %1207 = vmatprep.subr.bf16.mxu1 %v1481_v1  ;;  %s1021_s27 = sshll.u32 %s1484_s5, 4  ;;  %s1031_s28 = sshll.u32 %s1486_s1, 4  ;;  %s1022_s27 = int_to_ptr.vmem [resolvable:$true] %s1021_s27  ;;  %s1687_s28 = int_to_ptr.vmem [resolvable:$true] %s1031_s28 }
  0x3e   :  { %1113 = vmatmul.mubr.msk.bf16.vlgmr.msra.gmra.mrb[0].mxu0 %vm85_vm1, %v69_v6  ;;  %s1402_s9 = scalar_lea.vmem %s1022_s27, 32  ;;  %p1403_p11 = scmp.lt.s32.totalorder %s1022_s27, %s1022_s27 }
  0x3f   :  { %1212 = vmatpush3.bf16.msra.mxu0 %v1576_v7  ;;  %1135 = vmatprep.mubr.msk.f32.mxu0 %vm1480_vm0, %v1479_v0 }
  0x40   :  { %1213 = vmatprep.subr.bf16.mxu0 %v1481_v1  ;;  %1209 = vmatpush3.bf16.msra.mxu1 %v1580_v10 }
  0x41   :  { %1216 = vmatprep.subr.bf16.mxu1 %v1481_v1 }
  0x43   :  { %1215 = vmatpush3.bf16.msra.mxu0 %v1580_v10  ;;  %1125 = vmatmul.mubr.msk.f32.vlgmr.msra.gmra.mrb[0].mxu1 %vm137_vm2, %v130_v11 }
  0x44   :  { %1222 = vmatprep.subr.bf16.mxu0 %v1481_v1  ;;  %1218 = vmatpush3.bf16.msra.mxu1 %v1576_v7 }
  0x45   :  { %1146 = vmatprep.mubr.msk.f32.mxu1 %vm1480_vm0, %v1479_v0  ;;  %1219 = vmatprep.subr.bf16.mxu1 %v1481_v1 }
  0x48   :  { %1221 = vmatpush3.bf16.msra.mxu1 %v1580_v10 }
  0x49   :  { %1228 = vmatprep.subr.bf16.mxu1 %v1481_v1 }
 0x111   :  { %v123_v13 = vpop.f32.mrb[0].mxu0 }
 0x112   :  { %v124_v14 = vadd.f32 %v1048_v12, %v123_v13  ;;  %v1114_v15 = vpop.f32.mrb[1].mxu0 }
 0x113   :  { %v126_v16 = vpop.f32.mrb[2].mxu0 }
 0x114   :  { %129 = vst [vmem:[#allocation2] sm:$0xff] %v124_v14  ;;  %v1115_v17 = vpop.f32.mrb[3].mxu0 }
 0x116   :  { %v207_v18 = vpop.f32.mrb[0].mxu1 }
 0x117   :  { %v1126_v19 = vpop.f32.mrb[1].mxu1 }
 0x11b   :  { %v132_v20 = vld [vmem:[#allocation2] sm:$0x1]  ;;  %v250_v38 = vld [vmem:[#allocation2 + $0x1] sm:$0x1]  ;;  %v357_v56 = vld [vmem:[#allocation2 + $0x2] sm:$0x1] }
 0x11c   :  { %v211_v21 = vadd.f32 %v207_v18, %v132_v20  ;;  %v464_v14 = vld [vmem:[#allocation2 + $0x3] sm:$0x1] }
 0x11e   :  { %1268 = vtanh.f32 %v211_v21  ;;  %v1052_v24 = vmul.f32 -1.442695, %v211_v21 }
 0x120   :  { %1270 = vpow2.f32 %v1052_v24 }
 0x128   :  { %v1269_v22 = vpop.eup %1268 }
 0x129   :  { %229 = vrot.lane.b32.xlu0 %v1269_v22, %s1482_s24 }
 0x12a   :  { %v1271_v25 = vpop.eup %1270 }
 0x12b   :  { %v215_v26 = vadd.f32 1.0, %v1271_v25 }
 0x12d   :  { %224 = vrot.lane.b32.xlu0 %v1053_v23, %s1482_s24  ;;  %1272 = vrcp.f32 %v215_v26 }
 0x137   :  { %v1273_v27 = vpop.eup %1272 }
 0x19b   :  { %v230_v28 = vpop.permute.xlu0 %229 }
 0x19c   :  { %v232_v29 = vmul.f32 %v1273_v27, %v230_v28 }
 0x19e   :  { %234 = vrot.lane.b32.xlu1 %v232_v29, %s1482_s24 }
 0x19f   :  { %v225_v30 = vpop.permute.xlu0 %224 }
 0x1a0   :  { %v227_v31 = vmul.f32 %v1273_v27, %v225_v30 }
 0x210   :  { %v235_v32 = vpop.permute.xlu1 %234 }
 0x211   :  { %v237_v33 = vadd.f32 %v235_v32, %v227_v31  ;;  %v571_v32 = vld [vmem:[#allocation2 + $0x4] sm:$0x1] }
 0x213   :  { %1274 = vtanh.f32 %v237_v33 }
 0x21d   :  { %v1275_v34 = vpop.eup %1274 }
 0x21e   :  { %240 = vrot.lane.b32.xlu1 %v1275_v34, %s1482_s24 }
 0x290   :  { %v241_v35 = vpop.permute.xlu1 %240 }
 0x291   :  { %v243_v36 = vmul.f32 %v1273_v27, %v241_v35 }
 0x293   :  { %245 = vrot.lane.b32.xlu0 %v243_v36, %s1473_s15 }
 0x305   :  { %v246_v37 = vpop.permute.xlu0 %245 }
 0x306   :  { %249 = vst.msk [vmem:[#allocation9] sm:$0x1] %vm248_vm3, %v246_v37  ;;  %1136 = vmatmul.mubr.msk.f32.vlgmr.msra.gmra.mrb[4].mxu0 %vm137_vm2, %v246_v37 }
 0x307   :  { %1224 = vmatpush3.bf16.msra.mxu0 %v1576_v7  ;;  %1157 = vmatprep.mubr.msk.f32.mxu0 %vm1480_vm0, %v1479_v0 }
 0x308   :  { %1225 = vmatprep.subr.bf16.mxu0 %v1481_v1 }
 0x30b   :  { %1227 = vmatpush3.bf16.msra.mxu0 %v1580_v10 }
 0x30c   :  { %1234 = vmatprep.subr.bf16.mxu0 %v1481_v1 }
 0x3d9   :  { %v323_v39 = vpop.f32.mrb[4].mxu0 }
 0x3da   :  { %v327_v40 = vadd.f32 %v323_v39, %v250_v38  ;;  %v1137_v41 = vpop.f32.mrb[5].mxu0 }
 0x3dc   :  { %1276 = vtanh.f32 %v327_v40  ;;  %v1055_v43 = vmul.f32 -1.442695, %v327_v40 }
 0x3de   :  { %1278 = vpow2.f32 %v1055_v43 }
 0x3e6   :  { %v1277_v42 = vpop.eup %1276 }
 0x3e7   :  { %337 = vrot.lane.b32.xlu1 %v1277_v42, %s1482_s24 }
 0x3e8   :  { %v1279_v44 = vpop.eup %1278 }
 0x3e9   :  { %v331_v45 = vadd.f32 1.0, %v1279_v44 }
 0x3eb   :  { %1280 = vrcp.f32 %v331_v45 }
 0x3f5   :  { %v1281_v46 = vpop.eup %1280 }
 0x3f6   :  { %v335_v49 = vmul.f32 %v1281_v46, %v237_v33 }
 0x459   :  { %v338_v47 = vpop.permute.xlu1 %337 }
 0x45a   :  { %v340_v48 = vmul.f32 %v1281_v46, %v338_v47 }
 0x45c   :  { %342 = vrot.lane.b32.xlu0 %v340_v48, %s1482_s24 }
 0x4ce   :  { %v343_v50 = vpop.permute.xlu0 %342 }
 0x4cf   :  { %v345_v51 = vadd.f32 %v343_v50, %v335_v49  ;;  %v678_v50 = vld [vmem:[#allocation2 + $0x5] sm:$0x1] }
 0x4d1   :  { %1282 = vtanh.f32 %v345_v51 }
 0x4db   :  { %v1283_v52 = vpop.eup %1282 }
 0x4dc   :  { %348 = vrot.lane.b32.xlu1 %v1283_v52, %s1482_s24 }
 0x54e   :  { %v349_v53 = vpop.permute.xlu1 %348 }
 0x54f   :  { %v351_v54 = vmul.f32 %v1281_v46, %v349_v53 }
 0x551   :  { %353 = vrot.lane.b32.xlu0 %v351_v54, %s1473_s15 }
 0x5c3   :  { %v354_v55 = vpop.permute.xlu0 %353 }
 0x5c4   :  { %356 = vst.msk [vmem:[#allocation9 + $0x1] sm:$0x1] %vm248_vm3, %v354_v55  ;;  %1147 = vmatmul.mubr.msk.f32.vlgmr.msra.gmra.mrb[2].mxu1 %vm137_vm2, %v354_v55 }
 0x5c5   :  { %1230 = vmatpush3.bf16.msra.mxu1 %v1576_v7  ;;  %1168 = vmatprep.mubr.msk.f32.mxu1 %vm1480_vm0, %v1479_v0 }
 0x5c6   :  { %1231 = vmatprep.subr.bf16.mxu1 %v1481_v1 }
 0x5c9   :  { %1233 = vmatpush3.bf16.msra.mxu1 %v1580_v10 }
 0x5ca   :  { %1240 = vmatprep.subr.bf16.mxu1 %v1481_v1 }
 0x697   :  { %v430_v57 = vpop.f32.mrb[2].mxu1 }
 0x698   :  { %v434_v58 = vadd.f32 %v430_v57, %v357_v56  ;;  %v1148_v59 = vpop.f32.mrb[3].mxu1 }
 0x69a   :  { %1284 = vtanh.f32 %v434_v58  ;;  %v1057_v61 = vmul.f32 -1.442695, %v434_v58 }
 0x69c   :  { %1286 = vpow2.f32 %v1057_v61 }
 0x6a4   :  { %v1285_v60 = vpop.eup %1284 }
 0x6a5   :  { %444 = vrot.lane.b32.xlu1 %v1285_v60, %s1482_s24 }
 0x6a6   :  { %v1287_v62 = vpop.eup %1286 }
 0x6a7   :  { %v438_v63 = vadd.f32 1.0, %v1287_v62 }
 0x6a9   :  { %1288 = vrcp.f32 %v438_v63 }
 0x6b3   :  { %v1289_v2 = vpop.eup %1288 }
 0x6b4   :  { %v442_v5 = vmul.f32 %v1289_v2, %v345_v51 }
 0x717   :  { %v445_v3 = vpop.permute.xlu1 %444 }
 0x718   :  { %v447_v4 = vmul.f32 %v1289_v2, %v445_v3 }
 0x71a   :  { %449 = vrot.lane.b32.xlu0 %v447_v4, %s1482_s24 }
 0x78c   :  { %v450_v6 = vpop.permute.xlu0 %449 }
 0x78d   :  { %v452_v8 = vadd.f32 %v450_v6, %v442_v5 }
 0x78f   :  { %1290 = vtanh.f32 %v452_v8 }
 0x799   :  { %v1291_v9 = vpop.eup %1290 }
 0x79a   :  { %455 = vrot.lane.b32.xlu1 %v1291_v9, %s1482_s24 }
 0x80c   :  { %v456_v11 = vpop.permute.xlu1 %455 }
 0x80d   :  { %v458_v12 = vmul.f32 %v1289_v2, %v456_v11  ;;  %v785_v2 = vld [vmem:[#allocation2 + $0x6] sm:$0x1] }
 0x80f   :  { %460 = vrot.lane.b32.xlu0 %v458_v12, %s1473_s15 }
 0x881   :  { %v461_v13 = vpop.permute.xlu0 %460 }
 0x882   :  { %463 = vst.msk [vmem:[#allocation9 + $0x2] sm:$0x1] %vm248_vm3, %v461_v13  ;;  %1158 = vmatmul.mubr.msk.f32.vlgmr.msra.gmra.mrb[6].mxu0 %vm137_vm2, %v461_v13 }
 0x883   :  { %1236 = vmatpush3.bf16.msra.mxu0 %v1576_v7  ;;  %1179 = vmatprep.mubr.msk.f32.mxu0 %vm1480_vm0, %v1479_v0 }
 0x884   :  { %1237 = vmatprep.subr.bf16.mxu0 %v1481_v1 }
 0x887   :  { %1239 = vmatpush3.bf16.msra.mxu0 %v1580_v10 }
 0x888   :  { %1246 = vmatprep.subr.bf16.mxu0 %v1481_v1 }
 0x955   :  { %v537_v15 = vpop.f32.mrb[6].mxu0 }
 0x956   :  { %v541_v16 = vadd.f32 %v537_v15, %v464_v14  ;;  %v1159_v17 = vpop.f32.mrb[7].mxu0 }
 0x958   :  { %1292 = vtanh.f32 %v541_v16  ;;  %v1059_v19 = vmul.f32 -1.442695, %v541_v16 }
 0x95a   :  { %1294 = vpow2.f32 %v1059_v19 }
 0x962   :  { %v1293_v18 = vpop.eup %1292 }
 0x963   :  { %551 = vrot.lane.b32.xlu1 %v1293_v18, %s1482_s24 }
 0x964   :  { %v1295_v20 = vpop.eup %1294 }
 0x965   :  { %v545_v21 = vadd.f32 1.0, %v1295_v20 }
 0x967   :  { %1296 = vrcp.f32 %v545_v21 }
 0x971   :  { %v1297_v22 = vpop.eup %1296 }
 0x972   :  { %v549_v25 = vmul.f32 %v1297_v22, %v452_v8 }
 0x9d5   :  { %v552_v23 = vpop.permute.xlu1 %551 }
 0x9d6   :  { %v554_v24 = vmul.f32 %v1297_v22, %v552_v23 }
 0x9d8   :  { %556 = vrot.lane.b32.xlu0 %v554_v24, %s1482_s24 }
 0xa4a   :  { %v557_v26 = vpop.permute.xlu0 %556 }
 0xa4b   :  { %v559_v27 = vadd.f32 %v557_v26, %v549_v25 }
 0xa4d   :  { %1298 = vtanh.f32 %v559_v27 }
 0xa57   :  { %v1299_v28 = vpop.eup %1298 }
 0xa58   :  { %562 = vrot.lane.b32.xlu1 %v1299_v28, %s1482_s24 }
 0xaca   :  { %v563_v29 = vpop.permute.xlu1 %562 }
 0xacb   :  { %v565_v30 = vmul.f32 %v1297_v22, %v563_v29  ;;  %v892_v22 = vld [vmem:[#allocation2 + $0x7] sm:$0x1] }
 0xacd   :  { %567 = vrot.lane.b32.xlu0 %v565_v30, %s1473_s15 }
 0xb3f   :  { %v568_v31 = vpop.permute.xlu0 %567 }
 0xb40   :  { %570 = vst.msk [vmem:[#allocation9 + $0x3] sm:$0x1] %vm248_vm3, %v568_v31  ;;  %1169 = vmatmul.mubr.msk.f32.vlgmr.msra.gmra.mrb[4].mxu1 %vm137_vm2, %v568_v31 }
 0xb41   :  { %1242 = vmatpush3.bf16.msra.mxu1 %v1576_v7  ;;  %1190 = vmatprep.mubr.msk.f32.mxu1 %vm1480_vm0, %v1479_v0 }
 0xb42   :  { %1243 = vmatprep.subr.bf16.mxu1 %v1481_v1 }
 0xb45   :  { %1245 = vmatpush3.bf16.msra.mxu1 %v1580_v10 }
 0xc13   :  { %v644_v33 = vpop.f32.mrb[4].mxu1 }
 0xc14   :  { %v648_v34 = vadd.f32 %v644_v33, %v571_v32  ;;  %v1170_v35 = vpop.f32.mrb[5].mxu1 }
 0xc16   :  { %1300 = vtanh.f32 %v648_v34  ;;  %v1061_v37 = vmul.f32 -1.442695, %v648_v34 }
 0xc18   :  { %1302 = vpow2.f32 %v1061_v37 }
 0xc20   :  { %v1301_v36 = vpop.eup %1300 }
 0xc21   :  { %658 = vrot.lane.b32.xlu1 %v1301_v36, %s1482_s24 }
 0xc22   :  { %v1303_v38 = vpop.eup %1302 }
 0xc23   :  { %v652_v39 = vadd.f32 1.0, %v1303_v38 }
 0xc25   :  { %1304 = vrcp.f32 %v652_v39 }
 0xc2f   :  { %v1305_v40 = vpop.eup %1304 }
 0xc30   :  { %v656_v43 = vmul.f32 %v1305_v40, %v559_v27 }
 0xc93   :  { %v659_v41 = vpop.permute.xlu1 %658 }
 0xc94   :  { %v661_v42 = vmul.f32 %v1305_v40, %v659_v41 }
 0xc96   :  { %663 = vrot.lane.b32.xlu0 %v661_v42, %s1482_s24 }
 0xd08   :  { %v664_v44 = vpop.permute.xlu0 %663 }
 0xd09   :  { %v666_v45 = vadd.f32 %v664_v44, %v656_v43 }
 0xd0b   :  { %1306 = vtanh.f32 %v666_v45 }
 0xd15   :  { %v1307_v46 = vpop.eup %1306 }
 0xd16   :  { %669 = vrot.lane.b32.xlu1 %v1307_v46, %s1482_s24 }
 0xd88   :  { %v670_v47 = vpop.permute.xlu1 %669 }
 0xd89   :  { %v672_v48 = vmul.f32 %v1305_v40, %v670_v47 }
 0xd8b   :  { %674 = vrot.lane.b32.xlu0 %v672_v48, %s1473_s15 }
 0xdfd   :  { %v675_v49 = vpop.permute.xlu0 %674 }
 0xdfe   :  { %677 = vst.msk [vmem:[#allocation9 + $0x4] sm:$0x1] %vm248_vm3, %v675_v49  ;;  %1180 = vmatmul.mubr.msk.f32.vlgmr.msra.gmra.mrb[8].mxu0 %vm137_vm2, %v675_v49 }
 0xdff   :  { %1248 = vmatpush3.bf16.msra.mxu0 %v1576_v7  ;;  %1201 = vmatprep.mubr.msk.f32.mxu0 %vm1480_vm0, %v1479_v0 }
 0xe00   :  { %1249 = vmatprep.subr.bf16.mxu0 %v1481_v1 }
 0xe03   :  { %1251 = vmatpush3.bf16.msra.mxu0 %v1580_v10 }
 0xed1   :  { %v751_v51 = vpop.f32.mrb[8].mxu0 }
 0xed2   :  { %v755_v52 = vadd.f32 %v751_v51, %v678_v50  ;;  %v1181_v53 = vpop.f32.mrb[9].mxu0 }
 0xed4   :  { %1308 = vtanh.f32 %v755_v52  ;;  %v1063_v55 = vmul.f32 -1.442695, %v755_v52 }
 0xed6   :  { %1310 = vpow2.f32 %v1063_v55 }
 0xede   :  { %v1309_v54 = vpop.eup %1308 }
 0xedf   :  { %765 = vrot.lane.b32.xlu1 %v1309_v54, %s1482_s24 }
 0xee0   :  { %v1311_v56 = vpop.eup %1310 }
 0xee1   :  { %v759_v57 = vadd.f32 1.0, %v1311_v56 }
 0xee3   :  { %1312 = vrcp.f32 %v759_v57 }
 0xeed   :  { %v1313_v7 = vpop.eup %1312 }
 0xeee   :  { %v763_v1 = vmul.f32 %v1313_v7, %v666_v45 }
 0xf51   :  { %v766_v58 = vpop.permute.xlu1 %765 }
 0xf52   :  { %v768_v0 = vmul.f32 %v1313_v7, %v766_v58 }
 0xf54   :  { %770 = vrot.lane.b32.xlu0 %v768_v0, %s1482_s24 }
 0xfc6   :  { %v771_v10 = vpop.permute.xlu0 %770 }
 0xfc7   :  { %v773_v59 = vadd.f32 %v771_v10, %v763_v1 }
 0xfc9   :  { %1314 = vtanh.f32 %v773_v59 }
 0xfd3   :  { %v1315_v60 = vpop.eup %1314 }
 0xfd4   :  { %776 = vrot.lane.b32.xlu1 %v1315_v60, %s1482_s24 }
0x1046   :  { %v777_v61 = vpop.permute.xlu1 %776 }
0x1047   :  { %v779_v62 = vmul.f32 %v1313_v7, %v777_v61 }
0x1049   :  { %781 = vrot.lane.b32.xlu0 %v779_v62, %s1473_s15 }
0x10bb   :  { %v782_v63 = vpop.permute.xlu0 %781 }
0x10bc   :  { %784 = vst.msk [vmem:[#allocation9 + $0x5] sm:$0x1] %vm248_vm3, %v782_v63  ;;  %1191 = vmatmul.mubr.msk.f32.vlgmr.msra.gmra.mrb[6].mxu1 %vm137_vm2, %v782_v63 }
0x118f   :  { %v858_v3 = vpop.f32.mrb[6].mxu1 }
0x1190   :  { %v862_v4 = vadd.f32 %v858_v3, %v785_v2  ;;  %v1192_v5 = vpop.f32.mrb[7].mxu1 }
0x1192   :  { %1316 = vtanh.f32 %v862_v4  ;;  %v1065_v8 = vmul.f32 -1.442695, %v862_v4 }
0x1194   :  { %1318 = vpow2.f32 %v1065_v8 }
0x119c   :  { %v1317_v6 = vpop.eup %1316 }
0x119d   :  { %872 = vrot.lane.b32.xlu1 %v1317_v6, %s1482_s24 }
0x119e   :  { %v1319_v9 = vpop.eup %1318 }
0x119f   :  { %v866_v11 = vadd.f32 1.0, %v1319_v9 }
0x11a1   :  { %1320 = vrcp.f32 %v866_v11 }
0x11ab   :  { %v1321_v12 = vpop.eup %1320 }
0x11ac   :  { %v870_v15 = vmul.f32 %v1321_v12, %v773_v59 }
0x120f   :  { %v873_v13 = vpop.permute.xlu1 %872 }
0x1210   :  { %v875_v14 = vmul.f32 %v1321_v12, %v873_v13 }
0x1212   :  { %877 = vrot.lane.b32.xlu0 %v875_v14, %s1482_s24 }
0x1284   :  { %v878_v16 = vpop.permute.xlu0 %877 }
0x1285   :  { %v880_v17 = vadd.f32 %v878_v16, %v870_v15 }
0x1287   :  { %1322 = vtanh.f32 %v880_v17 }
0x1291   :  { %v1323_v18 = vpop.eup %1322 }
0x1292   :  { %883 = vrot.lane.b32.xlu1 %v1323_v18, %s1482_s24 }
0x1304   :  { %v884_v19 = vpop.permute.xlu1 %883 }
0x1305   :  { %v886_v20 = vmul.f32 %v1321_v12, %v884_v19 }
0x1307   :  { %888 = vrot.lane.b32.xlu0 %v886_v20, %s1473_s15 }
0x1379   :  { %v889_v21 = vpop.permute.xlu0 %888 }
0x137a   :  { %891 = vst.msk [vmem:[#allocation9 + $0x6] sm:$0x1] %vm248_vm3, %v889_v21  ;;  %1202 = vmatmul.mubr.msk.f32.vlgmr.msra.gmra.mrb[10].mxu0 %vm137_vm2, %v889_v21 }
0x144d   :  { %v965_v23 = vpop.f32.mrb[10].mxu0 }
0x144e   :  { %v969_v24 = vadd.f32 %v965_v23, %v892_v22  ;;  %v1203_v25 = vpop.f32.mrb[11].mxu0 }
0x1450   :  { %1324 = vtanh.f32 %v969_v24  ;;  %v1067_v27 = vmul.f32 -1.442695, %v969_v24 }
0x1452   :  { %1326 = vpow2.f32 %v1067_v27 }
0x145a   :  { %v1325_v26 = vpop.eup %1324 }
0x145b   :  { %979 = vrot.lane.b32.xlu1 %v1325_v26, %s1482_s24 }
0x145c   :  { %v1327_v28 = vpop.eup %1326 }
0x145d   :  { %v973_v29 = vadd.f32 1.0, %v1327_v28 }
0x145f   :  { %1328 = vrcp.f32 %v973_v29 }
0x1469   :  { %v1329_v30 = vpop.eup %1328 }
0x146a   :  { %v977_v33 = vmul.f32 %v1329_v30, %v880_v17 }
0x14cd   :  { %v980_v31 = vpop.permute.xlu1 %979 }
0x14ce   :  { %v982_v32 = vmul.f32 %v1329_v30, %v980_v31 }
0x14d0   :  { %984 = vrot.lane.b32.xlu0 %v982_v32, %s1482_s24 }
0x1542   :  { %v985_v34 = vpop.permute.xlu0 %984 }
0x1543   :  { %v987_v35 = vadd.f32 %v985_v34, %v977_v33 }
0x1545   :  { %1330 = vtanh.f32 %v987_v35 }
0x154f   :  { %v1331_v36 = vpop.eup %1330 }
0x1550   :  { %990 = vrot.lane.b32.xlu1 %v1331_v36, %s1482_s24 }
0x1554   :  { %1001 = vrot.lane.b32.xlu1 %v987_v35, %s1483_s3 }
0x15c2   :  { %v991_v37 = vpop.permute.xlu1 %990 }
0x15c3   :  { %v993_v38 = vmul.f32 %v1329_v30, %v991_v37 }
0x15c5   :  { %995 = vrot.lane.b32.xlu0 %v993_v38, %s1473_s15  ;;  %s1398_s15 = scalar_lea.vmem %s1022_s27, 16 }
0x15c6   :  { %v1002_v39 = vpop.permute.xlu1 %1001  ;;  %p1399_p10 = scmp.ne.s32.totalorder %s1022_s27, %s1398_s15  ;;  %p1404_p12 = scmp.lt.s32.totalorder %s1402_s9, %s1398_s15 }
0x15c7   :  { %1004 = vst.msk [vmem:[#allocation12] sm:$0x1] %vm248_vm3, %v1002_v39 }
0x15c8   :  { %p1405_p13 = por %p1404_p12, %p1403_p11 }
0x15ca   :  { %p1406_p0 = pnand %p1405_p13, %p1399_p10 }
0x1637   :  { %v996_v40 = vpop.permute.xlu0 %995 }
0x1638   :  { %998 = vst.msk [vmem:[#allocation9 + $0x7] sm:$0x1] %vm248_vm3, %v996_v40  ;;  %999 = vst.msk [vmem:[#allocation10] sm:$0x1] %vm248_vm3, %v996_v40 }
0x1639   :  { %1409 = shalt.err (!%p1406_p0)
}
0x163a   :  { %s1410_s12 = scalar_lea.hbm %s1743_s7, 16 }
0x163b   :  { %p1411_p1 = scmp.ne.s32.totalorder %s1743_s7, %s1410_s12  ;;  %p1414_p2 = scmp.lt.u32.totalorder %s1410_s12, %s1743_s7 }
0x163d   :  { %p1416_p3 = pnand %p1414_p2, %p1411_p1 }
0x163f   :  { %1419 = shalt.err (!%p1416_p3)
}
0x1640   :  { %1024 = dma.vmem_to_hbm [thread:$0]  %s1022_s27, 16, %s1743_s7, [#allocation11]  }
0x1641   :  { %s1420_s19 = scalar_lea.vmem %s1683_s30, 128  ;;  %p1425_p5 = scmp.lt.s32.totalorder %s1683_s30, %s1683_s30 }
0x1642   :  { %p1421_p4 = scmp.ne.s32.totalorder %s1683_s30, %s1420_s19  ;;  %p1426_p6 = scmp.lt.s32.totalorder %s1420_s19, %s1420_s19 }
0x1644   :  { %p1427_p7 = por %p1426_p6, %p1425_p5 }
0x1646   :  { %p1428_p8 = pnand %p1427_p7, %p1421_p4 }
0x1648   :  { %1431 = shalt.err (!%p1428_p8)
}
0x1649   :  { %s1432_s2 = scalar_lea.hbm %s1742_s6, 128 }
0x164a   :  { %p1433_p9 = scmp.ne.s32.totalorder %s1742_s6, %s1432_s2  ;;  %p1436_p10 = scmp.lt.u32.totalorder %s1432_s2, %s1742_s6 }
0x164c   :  { %p1438_p11 = pnand %p1436_p10, %p1433_p9 }
0x164e   :  { %1441 = shalt.err (!%p1438_p11)
}
0x164f   :  { %1014 = dma.vmem_to_hbm [thread:$0]  %s1683_s30, 128, %s1742_s6, [#allocation5]  }
0x1650   :  { %s1442_s26 = scalar_lea.vmem %s1687_s28, 16  ;;  %s1446_s3 = scalar_lea.vmem %s1687_s28, 32 }
0x1651   :  { %p1443_p12 = scmp.ne.s32.totalorder %s1687_s28, %s1442_s26  ;;  %p1447_p13 = scmp.lt.s32.totalorder %s1687_s28, %s1687_s28 }
0x1652   :  { %p1448_p0 = scmp.lt.s32.totalorder %s1446_s3, %s1442_s26 }
0x1654   :  { %p1449_p1 = por %p1448_p0, %p1447_p13 }
0x1656   :  { %p1450_p2 = pnand %p1449_p1, %p1443_p12 }
0x1658   :  { %1453 = shalt.err (!%p1450_p2)
}
0x1659   :  { %s1454_s29 = scalar_lea.hbm %s1744_s8, 16 }
0x165a   :  { %p1455_p3 = scmp.ne.s32.totalorder %s1744_s8, %s1454_s29  ;;  %p1458_p4 = scmp.lt.u32.totalorder %s1454_s29, %s1744_s8 }
0x165c   :  { %p1460_p5 = pnand %p1458_p4, %p1455_p3 }
0x165e   :  { %1463 = shalt.err (!%p1460_p5)
}
0x165f   :  { %1034 = dma.vmem_to_hbm [thread:$0]  %s1687_s28, 16, %s1744_s8, [#allocation11]  }
0x1660   :  { %1468 = dma.done.wait [#allocation5], 128  }
0x1661   :  { %1469 = vsyncadd [#allocation5], 4294967168 }
0x1662   :  { %1470 = dma.done.wait [#allocation11], 32  }
0x1663   :  { %1471 = vsyncadd [#allocation11], 4294967264 }
0x1664   :  { %1044 = vsyncpa [#allocation4], 1 }
0x1665   :  { %1045 = vsyncpa [#allocation7], 1 }
0x1666   :  { %1046 = vsyncpa [#allocation5], 1 }
0x1667   :  { %1047 = vsyncpa [#allocation11], 1 }

</bundles_post_ra>
